<compile_context>
chip_gen: v6e
topology: v6e:2x2x1
jax: 0.10.0
libtpu: 0.0.40
codegen_flags: <defaults>
</compile_context>

<pallas_src>
import jax
import jax.numpy as jnp
from jax.experimental import pallas as pl
from jax.experimental.pallas import tpu as pltpu

LANE = 128  # TPU lane width


def _round_up(n, m):
    return ((n + m - 1) // m) * m


def _mlp_kernel(*refs):
    """refs = (x_ref, w1, b1, w2, b2, ..., wN, bN, o_ref).

    x_ref/w*: bf16 (MXU operands), b*: f32, accumulation in f32 on the MXU.
    Static Python loop -> fully unrolled at trace time.
    """
    x_ref, o_ref = refs[0], refs[-1]
    wb = refs[1:-1]

    h = x_ref[...]                      # bf16 (TILE_B, 128)
    acc = None
    for li in range(0, len(wb), 2):
        w_ref, b_ref = wb[li], wb[li + 1]
        acc = jnp.dot(h, w_ref[...], preferred_element_type=jnp.float32)
        acc = jnp.maximum(acc + b_ref[...], 0.0)   # bias + ReLU in f32
        h = acc.astype(jnp.bfloat16)               # bf16 operand for next MXU pass
    o_ref[...] = acc.astype(o_ref.dtype)           # lane-dense f32 writeback


def flexible_model_forward(x, params, *, tile_b=1024):
    """Forward pass of FlexibleModel (Linear -> ReLU stack).

    x:      (batch, in_features) f32
    params: list of (W, b) with W:(in, out) f32 (already transposed vs torch),
            b:(out,) or (1, out) f32.
    """
    batch, in_feat = x.shape
    out_units = params[-1][0].shape[1]
    n_layers = len(params)

    # --- lane-dense padded dimensions -------------------------------------
    dims = [_round_up(in_feat, LANE)] + [_round_up(w.shape[1], LANE) for w, _ in params]

    # --- batch tiling ------------------------------------------------------
    tile_b = min(tile_b, _round_up(batch, 8))      # small batches: single tile
    batch_pad = _round_up(batch, tile_b)
    grid = (batch_pad // tile_b,)

    # --- pad + cast inputs once, outside the kernel ------------------------
    xp = jnp.zeros((batch_pad, dims[0]), jnp.bfloat16)
    xp = xp.at[:batch, :in_feat].set(x.astype(jnp.bfloat16))

    flat_args = [xp]
    in_specs = [pl.BlockSpec((tile_b, dims[0]), lambda i: (i, 0))]

    weight_bytes = 0
    for li, (w, b) in enumerate(params):
        din, dout = w.shape
        din_p, dout_p = dims[li], dims[li + 1]
        wp = jnp.zeros((din_p, dout_p), jnp.bfloat16)
        wp = wp.at[:din, :dout].set(w.astype(jnp.bfloat16))
        bp = jnp.zeros((1, dout_p), jnp.float32)
        bp = bp.at[:, :dout].set(jnp.reshape(b, (1, -1)).astype(jnp.float32))
        flat_args += [wp, bp]
        # Full-array blocks, same block index every grid step -> VMEM-resident.
        in_specs += [pl.BlockSpec((din_p, dout_p), lambda i: (0, 0)),
                     pl.BlockSpec((1, dout_p), lambda i: (0, 0))]
        weight_bytes += wp.size * 2 + bp.size * 4

    out_pad = dims[-1]

    flops = 2 * batch_pad * sum(dims[i] * dims[i + 1] for i in range(n_layers))
    bytes_accessed = xp.size * 2 + batch_pad * out_pad * 4 + weight_bytes

    out_padded = pl.pallas_call(
        _mlp_kernel,
        out_shape=jax.ShapeDtypeStruct((batch_pad, out_pad), jnp.float32),
        grid=grid,
        in_specs=in_specs,
        out_specs=pl.BlockSpec((tile_b, out_pad), lambda i: (i, 0)),
        compiler_params=pltpu.CompilerParams(
            dimension_semantics=("parallel",)),
        cost_estimate=pl.CostEstimate(
            flops=flops, transcendentals=0, bytes_accessed=bytes_accessed),
    )(*flat_args)

    return out_padded[:batch, :out_units]


def init_params(key, input_shape=124, hidden_units=(10, 10, 10, 10)):
    """Deterministic PyTorch-style uniform init: U(-1/sqrt(fan_in), 1/sqrt(fan_in))."""
    params = []
    dims = [input_shape] + list(hidden_units)
    for i in range(len(hidden_units)):
        key, kw, kb = jax.random.split(key, 3)
        bound = 1.0 / (dims[i] ** 0.5)
        w = jax.random.uniform(kw, (dims[i], dims[i + 1]),
                               minval=-bound, maxval=bound, dtype=jnp.float32)
        b = jax.random.uniform(kb, (1, dims[i + 1]),
                               minval=-bound, maxval=bound, dtype=jnp.float32)
        params.append((w, b))
    return params


def reference_forward_f32(x, params):
    """Pure f32 reference (matches the torch module's numerics)."""
    h = x
    for w, b in params:
        h = jnp.maximum(jnp.dot(h, w) + b, 0.0)
    return h


def reference_forward_bf16(x, params):
    """Reference with the same bf16-operand / f32-accumulate scheme as the kernel."""
    h = x.astype(jnp.bfloat16)
    for w, b in params:
        acc = jnp.dot(h, w.astype(jnp.bfloat16), preferred_element_type=jnp.float32)
        acc = jnp.maximum(acc + b, 0.0)
        h = acc.astype(jnp.bfloat16)
    return acc


if __name__ == "__main__":
    key = jax.random.PRNGKey(0)
    key, kx = jax.random.split(key)

    batch = 8
    input_shape = 124
    hidden_units = (10, 10, 10, 10)

    x = jax.random.normal(kx, (batch, input_shape), dtype=jnp.float32)
    params = init_params(key, input_shape, hidden_units)

    # Small batch: single-tile path.
    out = jax.block_until_ready(flexible_model_forward(x, params))
    assert out.shape == (batch, hidden_units[-1])

    ref_bf16 = reference_forward_bf16(x, params)
    ref_f32 = reference_forward_f32(x, params)
    assert jnp.allclose(out, ref_bf16, atol=1e-4, rtol=1e-4), "mismatch vs bf16 reference"
    assert jnp.allclose(out, ref_f32, atol=5e-2, rtol=5e-2), "mismatch vs f32 reference"

    # Larger, non-multiple batch: exercises the batch grid + padding path.
    key, kx2 = jax.random.split(key)
    x2 = jax.random.normal(kx2, (300, input_shape), dtype=jnp.float32)
    out2 = jax.block_until_ready(flexible_model_forward(x2, params, tile_b=128))
    assert out2.shape == (300, hidden_units[-1])
    ref2 = reference_forward_bf16(x2, params)
    assert jnp.allclose(out2, ref2, atol=1e-4, rtol=1e-4), "mismatch vs reference (tiled)"

    print("KERNEL_OK")
</pallas_src>

<mosaic_0001>
module attributes {stable_mosaic.version = 11 : i64} {
  func.func @_mlp_kernel(%arg0: i32, %arg1: memref<8x128xbf16, #tpu.memory_space<vmem>>, %arg2: memref<128x128xbf16, #tpu.memory_space<vmem>>, %arg3: memref<1x128xf32, #tpu.memory_space<vmem>>, %arg4: memref<128x128xbf16, #tpu.memory_space<vmem>>, %arg5: memref<1x128xf32, #tpu.memory_space<vmem>>, %arg6: memref<128x128xbf16, #tpu.memory_space<vmem>>, %arg7: memref<1x128xf32, #tpu.memory_space<vmem>>, %arg8: memref<128x128xbf16, #tpu.memory_space<vmem>>, %arg9: memref<1x128xf32, #tpu.memory_space<vmem>>, %arg10: memref<8x128xf32, #tpu.memory_space<vmem>>) attributes {dimension_semantics = [#tpu.dimension_semantics<parallel>], iteration_bounds = array<i64: 1>, scalar_prefetch = 0 : i64, scratch_operands = 0 : i64, tpu.core_type = #tpu.core_type<tc>, window_params = [{transform_indices = @transform_0, window_bounds = array<i64: 8, 128>}, {pipeline_mode = #tpu.pipeline_mode<synchronous>, transform_indices = @transform_1, window_bounds = array<i64: 128, 128>}, {pipeline_mode = #tpu.pipeline_mode<synchronous>, transform_indices = @transform_2, window_bounds = array<i64: 1, 128>}, {pipeline_mode = #tpu.pipeline_mode<synchronous>, transform_indices = @transform_3, window_bounds = array<i64: 128, 128>}, {pipeline_mode = #tpu.pipeline_mode<synchronous>, transform_indices = @transform_4, window_bounds = array<i64: 1, 128>}, {pipeline_mode = #tpu.pipeline_mode<synchronous>, transform_indices = @transform_5, window_bounds = array<i64: 128, 128>}, {pipeline_mode = #tpu.pipeline_mode<synchronous>, transform_indices = @transform_6, window_bounds = array<i64: 1, 128>}, {pipeline_mode = #tpu.pipeline_mode<synchronous>, transform_indices = @transform_7, window_bounds = array<i64: 128, 128>}, {pipeline_mode = #tpu.pipeline_mode<synchronous>, transform_indices = @transform_8, window_bounds = array<i64: 1, 128>}, {transform_indices = @transform_9, window_bounds = array<i64: 8, 128>}]} {
    %c0 = arith.constant 0 : index
    %c0_0 = arith.constant 0 : index
    %0 = vector.load %arg1[%c0, %c0_0] : memref<8x128xbf16, #tpu.memory_space<vmem>>, vector<8x128xbf16>
    %c0_1 = arith.constant 0 : index
    %c0_2 = arith.constant 0 : index
    %1 = vector.load %arg2[%c0_1, %c0_2] : memref<128x128xbf16, #tpu.memory_space<vmem>>, vector<128x128xbf16>
    %cst = arith.constant dense<0.000000e+00> : vector<8x128xf32>
    %2 = tpu.matmul %0, %1, %cst {dimension_numbers = #tpu.dot_dimension_numbers<[1], [0], [0], [1], [0, 0, 1, 1], [], []>} : vector<8x128xbf16>, vector<128x128xbf16>, vector<8x128xf32> -> vector<8x128xf32>
    %c0_3 = arith.constant 0 : index
    %c0_4 = arith.constant 0 : index
    %3 = vector.load %arg3[%c0_3, %c0_4] : memref<1x128xf32, #tpu.memory_space<vmem>>, vector<1x128xf32>
    %4 = vector.broadcast %3 : vector<1x128xf32> to vector<8x128xf32>
    %5 = arith.addf %2, %4 : vector<8x128xf32>
    %cst_5 = arith.constant 0.000000e+00 : f32
    %6 = vector.broadcast %cst_5 : f32 to vector<8x128xf32>
    %7 = arith.maximumf %5, %6 : vector<8x128xf32>
    %8 = arith.truncf %7 : vector<8x128xf32> to vector<8x128xbf16>
    %c0_6 = arith.constant 0 : index
    %c0_7 = arith.constant 0 : index
    %9 = vector.load %arg4[%c0_6, %c0_7] : memref<128x128xbf16, #tpu.memory_space<vmem>>, vector<128x128xbf16>
    %cst_8 = arith.constant dense<0.000000e+00> : vector<8x128xf32>
    %10 = tpu.matmul %8, %9, %cst_8 {dimension_numbers = #tpu.dot_dimension_numbers<[1], [0], [0], [1], [0, 0, 1, 1], [], []>} : vector<8x128xbf16>, vector<128x128xbf16>, vector<8x128xf32> -> vector<8x128xf32>
    %c0_9 = arith.constant 0 : index
    %c0_10 = arith.constant 0 : index
    %11 = vector.load %arg5[%c0_9, %c0_10] : memref<1x128xf32, #tpu.memory_space<vmem>>, vector<1x128xf32>
    %12 = vector.broadcast %11 : vector<1x128xf32> to vector<8x128xf32>
    %13 = arith.addf %10, %12 : vector<8x128xf32>
    %cst_11 = arith.constant 0.000000e+00 : f32
    %14 = vector.broadcast %cst_11 : f32 to vector<8x128xf32>
    %15 = arith.maximumf %13, %14 : vector<8x128xf32>
    %16 = arith.truncf %15 : vector<8x128xf32> to vector<8x128xbf16>
    %c0_12 = arith.constant 0 : index
    %c0_13 = arith.constant 0 : index
    %17 = vector.load %arg6[%c0_12, %c0_13] : memref<128x128xbf16, #tpu.memory_space<vmem>>, vector<128x128xbf16>
    %cst_14 = arith.constant dense<0.000000e+00> : vector<8x128xf32>
    %18 = tpu.matmul %16, %17, %cst_14 {dimension_numbers = #tpu.dot_dimension_numbers<[1], [0], [0], [1], [0, 0, 1, 1], [], []>} : vector<8x128xbf16>, vector<128x128xbf16>, vector<8x128xf32> -> vector<8x128xf32>
    %c0_15 = arith.constant 0 : index
    %c0_16 = arith.constant 0 : index
    %19 = vector.load %arg7[%c0_15, %c0_16] : memref<1x128xf32, #tpu.memory_space<vmem>>, vector<1x128xf32>
    %20 = vector.broadcast %19 : vector<1x128xf32> to vector<8x128xf32>
    %21 = arith.addf %18, %20 : vector<8x128xf32>
    %cst_17 = arith.constant 0.000000e+00 : f32
    %22 = vector.broadcast %cst_17 : f32 to vector<8x128xf32>
    %23 = arith.maximumf %21, %22 : vector<8x128xf32>
    %24 = arith.truncf %23 : vector<8x128xf32> to vector<8x128xbf16>
    %c0_18 = arith.constant 0 : index
    %c0_19 = arith.constant 0 : index
    %25 = vector.load %arg8[%c0_18, %c0_19] : memref<128x128xbf16, #tpu.memory_space<vmem>>, vector<128x128xbf16>
    %cst_20 = arith.constant dense<0.000000e+00> : vector<8x128xf32>
    %26 = tpu.matmul %24, %25, %cst_20 {dimension_numbers = #tpu.dot_dimension_numbers<[1], [0], [0], [1], [0, 0, 1, 1], [], []>} : vector<8x128xbf16>, vector<128x128xbf16>, vector<8x128xf32> -> vector<8x128xf32>
    %c0_21 = arith.constant 0 : index
    %c0_22 = arith.constant 0 : index
    %27 = vector.load %arg9[%c0_21, %c0_22] : memref<1x128xf32, #tpu.memory_space<vmem>>, vector<1x128xf32>
    %28 = vector.broadcast %27 : vector<1x128xf32> to vector<8x128xf32>
    %29 = arith.addf %26, %28 : vector<8x128xf32>
    %cst_23 = arith.constant 0.000000e+00 : f32
    %30 = vector.broadcast %cst_23 : f32 to vector<8x128xf32>
    %31 = arith.maximumf %29, %30 : vector<8x128xf32>
    %c0_24 = arith.constant 0 : index
    %c0_25 = arith.constant 0 : index
    %32 = vector.load %arg10[%c0_24, %c0_25] : memref<8x128xf32, #tpu.memory_space<vmem>>, vector<8x128xf32>
    tpu.vector_store %arg10[%c0_24, %c0_25], %31 {strides = array<i32>} : memref<8x128xf32, #tpu.memory_space<vmem>>, vector<8x128xf32>,
    return
  }
  func.func @transform_0(%arg0: i32) -> (i32, i32) {
    %c0_i32 = arith.constant 0 : i32
    %c0_i32_0 = arith.constant 0 : i32
    return %arg0, %c0_i32 : i32, i32
  }
  func.func @transform_1(%arg0: i32) -> (i32, i32) {
    %c0_i32 = arith.constant 0 : i32
    %c0_i32_0 = arith.constant 0 : i32
    %c0_i32_1 = arith.constant 0 : i32
    return %c0_i32, %c0_i32_0 : i32, i32
  }
  func.func @transform_2(%arg0: i32) -> (i32, i32) {
    %c0_i32 = arith.constant 0 : i32
    %c0_i32_0 = arith.constant 0 : i32
    %c0_i32_1 = arith.constant 0 : i32
    return %c0_i32, %c0_i32_0 : i32, i32
  }
  func.func @transform_3(%arg0: i32) -> (i32, i32) {
    %c0_i32 = arith.constant 0 : i32
    %c0_i32_0 = arith.constant 0 : i32
    %c0_i32_1 = arith.constant 0 : i32
    return %c0_i32, %c0_i32_0 : i32, i32
  }
  func.func @transform_4(%arg0: i32) -> (i32, i32) {
    %c0_i32 = arith.constant 0 : i32
    %c0_i32_0 = arith.constant 0 : i32
    %c0_i32_1 = arith.constant 0 : i32
    return %c0_i32, %c0_i32_0 : i32, i32
  }
  func.func @transform_5(%arg0: i32) -> (i32, i32) {
    %c0_i32 = arith.constant 0 : i32
    %c0_i32_0 = arith.constant 0 : i32
    %c0_i32_1 = arith.constant 0 : i32
    return %c0_i32, %c0_i32_0 : i32, i32
  }
  func.func @transform_6(%arg0: i32) -> (i32, i32) {
    %c0_i32 = arith.constant 0 : i32
    %c0_i32_0 = arith.constant 0 : i32
    %c0_i32_1 = arith.constant 0 : i32
    return %c0_i32, %c0_i32_0 : i32, i32
  }
  func.func @transform_7(%arg0: i32) -> (i32, i32) {
    %c0_i32 = arith.constant 0 : i32
    %c0_i32_0 = arith.constant 0 : i32
    %c0_i32_1 = arith.constant 0 : i32
    return %c0_i32, %c0_i32_0 : i32, i32
  }
  func.func @transform_8(%arg0: i32) -> (i32, i32) {
    %c0_i32 = arith.constant 0 : i32
    %c0_i32_0 = arith.constant 0 : i32
    %c0_i32_1 = arith.constant 0 : i32
    return %c0_i32, %c0_i32_0 : i32, i32
  }
  func.func @transform_9(%arg0: i32) -> (i32, i32) {
    %c0_i32 = arith.constant 0 : i32
    %c0_i32_0 = arith.constant 0 : i32
    return %arg0, %c0_i32 : i32, i32
  }
}

</mosaic_0001>

<bundles_post_ra>
// kernel: tpu_custom_call.1
= control target key start
LH: loop header
LB: loop body
LE: loop exit
PB: predicated region body
PF: predicated region fallthrough
CT: control target
= control target key end

     0   :  { %14 = vsyncpa [#allocation3], 0  ;;  %s1034_s0 = inlined_call_operand.hbm [shape: bf16[8,128], index: 0, kind: input, shape index: {}]   ;;  %s1035_s1 = inlined_call_operand.hbm [shape: bf16[128,128], index: 1, kind: input, shape index: {}]   ;;  %s1036_s2 = inlined_call_operand.vmem [shape: f32[1,128], index: 2, kind: input, shape index: {}]   ;;  %s1037_s3 = inlined_call_operand.hbm [shape: bf16[128,128], index: 3, kind: input, shape index: {}]   ;;  %s1038_s4 = inlined_call_operand.vmem [shape: f32[1,128], index: 4, kind: input, shape index: {}]   ;;  %s1039_s5 = inlined_call_operand.hbm [shape: bf16[128,128], index: 5, kind: input, shape index: {}]   ;;  %s1040_s6 = inlined_call_operand.vmem [shape: f32[1,128], index: 6, kind: input, shape index: {}]   ;;  %s1041_s7 = inlined_call_operand.hbm [shape: bf16[128,128], index: 7, kind: input, shape index: {}]   ;;  %s1042_s8 = inlined_call_operand.vmem [shape: f32[1,128], index: 8, kind: input, shape index: {}]   ;;  %s1043_s9 = inlined_call_operand.hbm [shape: f32[8,128], index: 9, kind: output, shape index: {}]  }
   0x1   :  { %15 = vsyncpa [#allocation6], 0 }
   0x2   :  { %16 = vsyncpa [#allocation9], 0 }
   0x3   :  { %17 = vsyncpa [#allocation4], 0  ;;  %s892_s30 = smov [#allocation5]  }
   0x4   :  { %s33_s10 = sshll.u32 %s892_s30, 4  ;;  %s34_s10 = int_to_ptr.vmem [resolvable:$true] %s33_s10 }
   0x5   :  { %s772_s11 = scalar_lea.vmem %s34_s10, 1024  ;;  %p777_p1 = scmp.lt.s32.totalorder %s34_s10, %s34_s10 }
   0x6   :  { %p773_p0 = scmp.ne.s32.totalorder %s34_s10, %s772_s11  ;;  %p778_p2 = scmp.lt.s32.totalorder %s772_s11, %s772_s11 }
   0x8   :  { %p779_p3 = por %p778_p2, %p777_p1 }
   0xa   :  { %p780_p4 = pnand %p779_p3, %p773_p0 }
   0xc   :  { %783 = shalt.err (!%p780_p4)
}
   0xd   :  { %s893_s12 = smov 64   ;;  %s894_s13 = smov 4  }
   0xe   :  { %39 = dma.hbm_to_vmem [thread:$0]  %s1035_s1, 1024, %s34_s10, [#allocation6], %s893_s12, %s893_s12, %s894_s13  }
   0xf   :  { %s895_s16 = smov [#allocation8]   ;;  %s896_s18 = smov [#allocation2]  }
  0x10   :  { %s61_s17 = sshll.u32 %s895_s16, 4  ;;  %s24_s19 = sshll.u32 %s896_s18, 4  ;;  %s62_s17 = int_to_ptr.vmem [resolvable:$true] %s61_s17  ;;  %s25_s19 = int_to_ptr.vmem [resolvable:$true] %s24_s19 }
  0x11   :  { %s792_s20 = scalar_lea.vmem %s62_s17, 1024  ;;  %p797_p6 = scmp.lt.s32.totalorder %s62_s17, %s62_s17 }
  0x12   :  { %p793_p5 = scmp.ne.s32.totalorder %s62_s17, %s792_s20  ;;  %p798_p7 = scmp.lt.s32.totalorder %s792_s20, %s792_s20 }
  0x14   :  { %p799_p8 = por %p798_p7, %p797_p6 }
  0x16   :  { %p800_p9 = pnand %p799_p8, %p793_p5 }
  0x18   :  { %803 = shalt.err (!%p800_p9)
}
  0x19   :  { %67 = dma.hbm_to_vmem [thread:$0]  %s1039_s5, 1024, %s62_s17, [#allocation9], %s893_s12, %s893_s12, %s894_s13  }
  0x1a   :  { %s812_s1 = scalar_lea.vmem %s25_s19, 64  ;;  %p817_p11 = scmp.lt.s32.totalorder %s25_s19, %s25_s19 }
  0x1b   :  { %p813_p10 = scmp.ne.s32.totalorder %s25_s19, %s812_s1  ;;  %p818_p12 = scmp.lt.s32.totalorder %s812_s1, %s812_s1 }
  0x1d   :  { %p819_p13 = por %p818_p12, %p817_p11 }
  0x1f   :  { %p820_p0 = pnand %p819_p13, %p813_p10 }
  0x21   :  { %823 = shalt.err (!%p820_p0)
}
  0x22   :  { %27 = dma.hbm_to_vmem [thread:$0]  %s1034_s0, 64, %s25_s19, [#allocation3]  }
  0x23   :  { %s897_s25 = smov [#allocation7]   ;;  %s898_s27 = smov [#allocation10]  }
  0x24   :  { %s47_s26 = sshll.u32 %s897_s25, 4  ;;  %s75_s28 = sshll.u32 %s898_s27, 4  ;;  %s48_s26 = int_to_ptr.vmem [resolvable:$true] %s47_s26  ;;  %s76_s28 = int_to_ptr.vmem [resolvable:$true] %s75_s28 }
  0x25   :  { %s832_s29 = scalar_lea.vmem %s48_s26, 1024  ;;  %p837_p2 = scmp.lt.s32.totalorder %s48_s26, %s48_s26 }
  0x26   :  { %p833_p1 = scmp.ne.s32.totalorder %s48_s26, %s832_s29  ;;  %p838_p3 = scmp.lt.s32.totalorder %s832_s29, %s832_s29 }
  0x28   :  { %p839_p4 = por %p838_p3, %p837_p2 }
  0x2a   :  { %p840_p5 = pnand %p839_p4, %p833_p1 }
  0x2c   :  { %843 = shalt.err (!%p840_p5)
}
  0x2d   :  { %53 = dma.hbm_to_vmem [thread:$0]  %s1037_s3, 1024, %s48_s26, [#allocation6], %s893_s12, %s893_s12, %s894_s13  }
  0x2e   :  { %s852_s0 = scalar_lea.vmem %s76_s28, 1024  ;;  %p857_p7 = scmp.lt.s32.totalorder %s76_s28, %s76_s28 }
  0x2f   :  { %p853_p6 = scmp.ne.s32.totalorder %s76_s28, %s852_s0  ;;  %p858_p8 = scmp.lt.s32.totalorder %s852_s0, %s852_s0 }
  0x31   :  { %p859_p9 = por %p858_p8, %p857_p7 }
  0x33   :  { %p860_p10 = pnand %p859_p9, %p853_p6 }
  0x35   :  { %863 = shalt.err (!%p860_p10)
}
  0x36   :  { %81 = dma.hbm_to_vmem [thread:$0]  %s1041_s7, 1024, %s76_s28, [#allocation9], %s893_s12, %s893_s12, %s894_s13  }
  0x37   :  { %884 = dma.done.wait [#allocation3], 64  }
  0x38   :  { %885 = vsyncadd [#allocation3], 4294967232 }
  0x39   :  { %886 = dma.done.wait [#allocation6], 2048  }
  0x3a   :  { %887 = vsyncadd [#allocation6], 4294965248 }
  0x3b   :  { %888 = dma.done.wait [#allocation9], 2048  }
  0x3c   :  { %889 = vsyncadd [#allocation9], 4294965248  ;;  %v899_v0 = vmov 0.0   ;;  %vm900_vm0 = vmmov 0   ;;  %v732_v1 = vld [vmem:[#allocation5 + $0x38] sm:$0xff]   ;;  %v733_v2 = vld [vmem:[#allocation5 + $0x30] sm:$0xff]  }
  0x3d   :  { %642 = vmatprep.subr.bf16.mxu0 %v899_v0  ;;  %658 = vmatprep.mubr.msk.bf16.mxu0 %vm900_vm0, %v899_v0  ;;  %v734_v3 = vld [vmem:[#allocation5 + $0x28] sm:$0xff]   ;;  %v740_v4 = vld [vmem:[#allocation7 + $0x38] sm:$0xff]   ;;  %v735_v5 = vld [vmem:[#allocation5 + $0x20] sm:$0xff]   ;;  %s901_s16 = smov [#allocation11]  }
  0x3e   :  { %662 = vmatprep.subr.bf16.mxu1 %v899_v0  ;;  %678 = vmatprep.mubr.msk.bf16.mxu1 %vm900_vm0, %v899_v0  ;;  %v741_v6 = vld [vmem:[#allocation7 + $0x30] sm:$0xff]   ;;  %v736_v7 = vld [vmem:[#allocation5 + $0x18] sm:$0xff]   ;;  %v742_v8 = vld [vmem:[#allocation7 + $0x28] sm:$0xff]   ;;  %s559_s17 = sshll.u32 %s901_s16, 4  ;;  %s560_s17 = int_to_ptr.vmem [resolvable:$true] %s559_s17 }
  0x3f   :  { %643 = vmatpush3.bf16.msra.mxu0 %v732_v1  ;;  %663 = vmatpush3.bf16.msra.mxu1 %v740_v4  ;;  %v737_v9 = vld [vmem:[#allocation5 + $0x10] sm:$0xff]   ;;  %v743_v10 = vld [vmem:[#allocation7 + $0x20] sm:$0xff]   ;;  %v738_v11 = vld [vmem:[#allocation5 + $0x8] sm:$0xff]   ;;  %p869_p12 = scmp.lt.s32.totalorder %s560_s17, %s560_s17 }
  0x40   :  { %644 = vmatprep.subr.bf16.mxu0 %v899_v0  ;;  %664 = vmatprep.subr.bf16.mxu1 %v899_v0  ;;  %v744_v12 = vld [vmem:[#allocation7 + $0x18] sm:$0xff]   ;;  %v739_v13 = vld [vmem:[#allocation5] sm:$0xff]   ;;  %v745_v14 = vld [vmem:[#allocation7 + $0x10] sm:$0xff]  }
  0x41   :  { %v100_v15 = vld [vmem:[#allocation2] sm:$0xf]  ;;  %v746_v16 = vld [vmem:[#allocation7 + $0x8] sm:$0xff]   ;;  %v747_v17 = vld [vmem:[#allocation7] sm:$0xff]  }
  0x42   :  { %v748_v18 = vld [vmem:[#allocation8 + $0x38] sm:$0xff]   ;;  %v749_v19 = vld [vmem:[#allocation8 + $0x30] sm:$0xff]   ;;  %v750_v20 = vld [vmem:[#allocation8 + $0x28] sm:$0xff]  }
  0x43   :  { %645 = vmatpush3.bf16.msra.mxu0 %v733_v2  ;;  %665 = vmatpush3.bf16.msra.mxu1 %v741_v6  ;;  %v751_v21 = vld [vmem:[#allocation8 + $0x20] sm:$0xff]   ;;  %v752_v22 = vld [vmem:[#allocation8 + $0x18] sm:$0xff]   ;;  %v753_v23 = vld [vmem:[#allocation8 + $0x10] sm:$0xff]  }
  0x44   :  { %646 = vmatprep.subr.bf16.mxu0 %v899_v0  ;;  %666 = vmatprep.subr.bf16.mxu1 %v899_v0  ;;  %v570_v24 = vld [vmem:[%s1036_s2] ss:$0 sm:$0xff]  ;;  %v754_v32 = vld [vmem:[#allocation8 + $0x8] sm:$0xff]   ;;  %v755_v33 = vld [vmem:[#allocation8] sm:$0xff]  }
  0x45   :  { %v756_v34 = vld [vmem:[#allocation10 + $0x38] sm:$0xff]   ;;  %v757_v35 = vld [vmem:[#allocation10 + $0x30] sm:$0xff]   ;;  %v758_v36 = vld [vmem:[#allocation10 + $0x28] sm:$0xff]  }
  0x46   :  { %v759_v37 = vld [vmem:[#allocation10 + $0x20] sm:$0xff]   ;;  %v760_v38 = vld [vmem:[#allocation10 + $0x18] sm:$0xff]   ;;  %v761_v39 = vld [vmem:[#allocation10 + $0x10] sm:$0xff]  }
  0x47   :  { %647 = vmatpush3.bf16.msra.mxu0 %v734_v3  ;;  %667 = vmatpush3.bf16.msra.mxu1 %v742_v8  ;;  %v579_v40 = vld [vmem:[%s1038_s4] ss:$0 sm:$0xff]  ;;  %v762_v48 = vld [vmem:[#allocation10 + $0x8] sm:$0xff]   ;;  %v763_v49 = vld [vmem:[#allocation10] sm:$0xff]  }
  0x48   :  { %648 = vmatprep.subr.bf16.mxu0 %v899_v0  ;;  %668 = vmatprep.subr.bf16.mxu1 %v899_v0  ;;  %v588_v50 = vld [vmem:[%s1040_s6] ss:$0 sm:$0xff]  ;;  %s864_s6 = scalar_lea.vmem %s560_s17, 128 }
  0x49   :  { %v597_v58 = vld [vmem:[%s1042_s8] ss:$0 sm:$0xff]  ;;  %p865_p11 = scmp.ne.s32.totalorder %s560_s17, %s864_s6  ;;  %p870_p13 = scmp.lt.s32.totalorder %s864_s6, %s864_s6 }
  0x4b   :  { %649 = vmatpush3.bf16.msra.mxu0 %v735_v5  ;;  %669 = vmatpush3.bf16.msra.mxu1 %v743_v10  ;;  %p871_p0 = por %p870_p13, %p869_p12 }
  0x4c   :  { %650 = vmatprep.subr.bf16.mxu0 %v899_v0  ;;  %670 = vmatprep.subr.bf16.mxu1 %v899_v0 }
  0x4d   :  { %p872_p1 = pnand %p871_p0, %p865_p11 }
  0x4f   :  { %651 = vmatpush3.bf16.msra.mxu0 %v736_v7  ;;  %671 = vmatpush3.bf16.msra.mxu1 %v744_v12 }
  0x50   :  { %652 = vmatprep.subr.bf16.mxu0 %v899_v0  ;;  %672 = vmatprep.subr.bf16.mxu1 %v899_v0 }
  0x53   :  { %653 = vmatpush3.bf16.msra.mxu0 %v737_v9  ;;  %673 = vmatpush3.bf16.msra.mxu1 %v745_v14 }
  0x54   :  { %654 = vmatprep.subr.bf16.mxu0 %v899_v0  ;;  %674 = vmatprep.subr.bf16.mxu1 %v899_v0 }
  0x57   :  { %655 = vmatpush3.bf16.msra.mxu0 %v738_v11  ;;  %675 = vmatpush3.bf16.msra.mxu1 %v746_v16 }
  0x58   :  { %656 = vmatprep.subr.bf16.mxu0 %v899_v0  ;;  %676 = vmatprep.subr.bf16.mxu1 %v899_v0 }
  0x5b   :  { %657 = vmatpush3.bf16.msra.mxu0 %v739_v13  ;;  %677 = vmatpush3.bf16.msra.mxu1 %v747_v17 }
  0x5c   :  { %682 = vmatprep.subr.bf16.mxu0 %v899_v0  ;;  %702 = vmatprep.subr.bf16.mxu1 %v899_v0 }
  0x5e   :  { %659 = vmatmul.mubr.bf16.vlgmr.msra.gmra.mxu0 %v100_v15 }
  0x5f   :  { %698 = vmatprep.mubr.msk.bf16.mxu0 %vm900_vm0, %v899_v0  ;;  %683 = vmatpush3.bf16.msra.mxu0 %v748_v18 }
  0x60   :  { %684 = vmatprep.subr.bf16.mxu0 %v899_v0 }
  0x63   :  { %685 = vmatpush3.bf16.msra.mxu0 %v749_v19 }
  0x64   :  { %686 = vmatprep.subr.bf16.mxu0 %v899_v0 }
  0x67   :  { %687 = vmatpush3.bf16.msra.mxu0 %v750_v20 }
  0x68   :  { %688 = vmatprep.subr.bf16.mxu0 %v899_v0 }
  0x6b   :  { %689 = vmatpush3.bf16.msra.mxu0 %v751_v21 }
  0x6c   :  { %690 = vmatprep.subr.bf16.mxu0 %v899_v0 }
  0x6f   :  { %691 = vmatpush3.bf16.msra.mxu0 %v752_v22 }
  0x70   :  { %692 = vmatprep.subr.bf16.mxu0 %v899_v0 }
  0x73   :  { %693 = vmatpush3.bf16.msra.mxu0 %v753_v23 }
  0x74   :  { %694 = vmatprep.subr.bf16.mxu0 %v899_v0 }
  0x77   :  { %695 = vmatpush3.bf16.msra.mxu0 %v754_v32 }
  0x78   :  { %696 = vmatprep.subr.bf16.mxu0 %v899_v0 }
  0x7b   :  { %697 = vmatpush3.bf16.msra.mxu0 %v755_v33 }
 0x11e   :  { %v206_v25 = vpop.f32.mrf.mxu0 }
 0x11f   :  { %v207_v26 = vadd.f32 %v570_v24, %v206_v25 }
 0x120   :  { %v660_v27 = vpop.f32.mrf.mxu0 }
 0x121   :  { %v212_v28 = vmax.f32 %v207_v26, 0.0 }
 0x122   :  { %v209_v29 = vpop.f32.mrf.mxu0 }
 0x123   :  { %v213_v30 = vpack.c.bf16 %v212_v28, %v212_v28 }
 0x124   :  { %v661_v31 = vpop.f32.mrf.mxu0 }
 0x125   :  { %679 = vmatmul.mubr.bf16.vlgmr.msra.gmra.mxu1 %v213_v30 }
 0x126   :  { %718 = vmatprep.mubr.msk.bf16.mxu1 %vm900_vm0, %v899_v0  ;;  %703 = vmatpush3.bf16.msra.mxu1 %v756_v34 }
 0x127   :  { %704 = vmatprep.subr.bf16.mxu1 %v899_v0 }
 0x12a   :  { %705 = vmatpush3.bf16.msra.mxu1 %v757_v35 }
 0x12b   :  { %706 = vmatprep.subr.bf16.mxu1 %v899_v0 }
 0x12e   :  { %707 = vmatpush3.bf16.msra.mxu1 %v758_v36 }
 0x12f   :  { %708 = vmatprep.subr.bf16.mxu1 %v899_v0 }
 0x132   :  { %709 = vmatpush3.bf16.msra.mxu1 %v759_v37 }
 0x133   :  { %710 = vmatprep.subr.bf16.mxu1 %v899_v0 }
 0x136   :  { %711 = vmatpush3.bf16.msra.mxu1 %v760_v38 }
 0x137   :  { %712 = vmatprep.subr.bf16.mxu1 %v899_v0 }
 0x13a   :  { %713 = vmatpush3.bf16.msra.mxu1 %v761_v39 }
 0x13b   :  { %714 = vmatprep.subr.bf16.mxu1 %v899_v0 }
 0x13e   :  { %715 = vmatpush3.bf16.msra.mxu1 %v762_v48 }
 0x13f   :  { %716 = vmatprep.subr.bf16.mxu1 %v899_v0 }
 0x142   :  { %717 = vmatpush3.bf16.msra.mxu1 %v763_v49 }
 0x1e5   :  { %v319_v41 = vpop.f32.mrf.mxu1 }
 0x1e6   :  { %v320_v42 = vadd.f32 %v579_v40, %v319_v41 }
 0x1e7   :  { %v680_v43 = vpop.f32.mrf.mxu1 }
 0x1e8   :  { %v325_v44 = vmax.f32 %v320_v42, 0.0 }
 0x1e9   :  { %v322_v45 = vpop.f32.mrf.mxu1 }
 0x1ea   :  { %v326_v46 = vpack.c.bf16 %v325_v44, %v325_v44 }
 0x1eb   :  { %v681_v47 = vpop.f32.mrf.mxu1 }
 0x1ec   :  { %699 = vmatmul.mubr.bf16.vlgmr.msra.gmra.mxu0 %v326_v46 }
 0x2ac   :  { %v432_v51 = vpop.f32.mrf.mxu0 }
 0x2ad   :  { %v433_v52 = vadd.f32 %v588_v50, %v432_v51 }
 0x2ae   :  { %v700_v53 = vpop.f32.mrf.mxu0 }
 0x2af   :  { %v438_v54 = vmax.f32 %v433_v52, 0.0 }
 0x2b0   :  { %v435_v55 = vpop.f32.mrf.mxu0 }
 0x2b1   :  { %v439_v56 = vpack.c.bf16 %v438_v54, %v438_v54 }
 0x2b2   :  { %v701_v57 = vpop.f32.mrf.mxu0 }
 0x2b3   :  { %719 = vmatmul.mubr.bf16.vlgmr.msra.gmra.mxu1 %v439_v56 }
 0x373   :  { %v545_v59 = vpop.f32.mrf.mxu1 }
 0x374   :  { %v546_v60 = vadd.f32 %v597_v58, %v545_v59 }
 0x375   :  { %v720_v61 = vpop.f32.mrf.mxu1 }
 0x376   :  { %v551_v62 = vmax.f32 %v546_v60, 0.0 }
 0x377   :  { %v548_v63 = vpop.f32.mrf.mxu1 }
 0x378   :  { %552 = vst [vmem:[#allocation11] sm:$0xff] %v551_v62 }
 0x379   :  { %v721_v0 = vpop.f32.mrf.mxu1 }
 0x37a   :  { %875 = shalt.err (!%p872_p1)
}
 0x37b   :  { %562 = dma.vmem_to_hbm [thread:$0]  %s560_s17, 128, %s1043_s9, [#allocation4]  }
 0x37c   :  { %890 = dma.done.wait [#allocation4], 128  }
 0x37d   :  { %891 = vsyncadd [#allocation4], 4294967168 }
 0x37e   :  { %566 = vsyncpa [#allocation3], 1 }
 0x37f   :  { %567 = vsyncpa [#allocation6], 1 }
 0x380   :  { %568 = vsyncpa [#allocation9], 1 }
 0x381   :  { %569 = vsyncpa [#allocation4], 1 }

</bundles_post_ra>
